<compile_context>
chip_gen: v6e
topology: v6e:2x2x1
jax: 0.10.0
libtpu: 0.0.40
codegen_flags: <defaults>
</compile_context>

<pallas_src>
import jax
import jax.numpy as jnp
from jax.experimental import pallas as pl
from jax.experimental.pallas import tpu as pltpu


def _ce_kernel(x_ref, lab_ref, w_ref, loss_ref):
    """Softmax cross-entropy for one (tile_n, C) row tile.

    x_ref:    (TN, C) logits (native dtype; cast to f32 in-kernel)
    lab_ref:  (TN, 1) int32 class indices
    w_ref:    (TN, 1) f32 per-sample weights
    loss_ref: (TN, 1) f32 weighted per-sample loss
    """
    logits = x_ref[...].astype(jnp.float32)                        # (TN, C)
    m = jnp.max(logits, axis=-1, keepdims=True)                    # XLU reduce
    lse = m + jnp.log(jnp.sum(jnp.exp(logits - m), axis=-1, keepdims=True))

    lab = lab_ref[...]                                             # (TN, 1)
    cols = jax.lax.broadcasted_iota(jnp.int32, logits.shape, 1)    # (TN, C)
    # Gather logits[row, label[row]] without a cross-lane gather: one-hot
    # select + row reduce (C already resident in vregs from the lse pass).
    tgt = jnp.sum(jnp.where(cols == lab, logits, 0.0),
                  axis=-1, keepdims=True)                          # (TN, 1)

    # Out-of-range labels (torch ignore_index=-100 style, or garbage rows of
    # the ragged edge tile) contribute zero loss; edge-tile stores beyond N
    # are additionally masked by Pallas itself.
    num_classes = logits.shape[-1]
    valid = jnp.logical_and(lab >= 0, lab < num_classes)
    loss = jnp.where(valid, lse - tgt, 0.0) * w_ref[...].astype(jnp.float32)
    loss_ref[...] = loss


# Tile-sizing knobs: keep the double-buffered logits tile around 8 MiB so it
# fits comfortably under every generation's scoped-VMEM limit while being
# large enough to amortize per-grid-step pipeline overhead.
_VMEM_LOGITS_BUDGET_BYTES = 8 * 1024 * 1024
_MAX_TILE_N = 4096
_MIN_TILE_N = 8


def _choose_tile_n(n, c, itemsize):
    rows = _VMEM_LOGITS_BUDGET_BYTES // max(1, 2 * c * itemsize)
    rows = max(_MIN_TILE_N, min(_MAX_TILE_N, rows))
    rows = (rows // 8) * 8                  # sublane multiple
    n_rounded = ((n + 7) // 8) * 8          # don't allocate far beyond N
    return max(_MIN_TILE_N, min(rows, n_rounded))


def _pallas_softmax_ce(cls_score, label, weight, tile_n=None):
    """Returns weighted per-sample loss, shape (N,), f32."""
    N, C = cls_score.shape
    if tile_n is None:
        tile_n = _choose_tile_n(N, C, jnp.dtype(cls_score.dtype).itemsize)

    lab2 = label.reshape(N, 1).astype(jnp.int32)
    w2 = weight.reshape(N, 1).astype(jnp.float32)

    grid = (pl.cdiv(N, tile_n),)
    # NOTE: per-sample loss is written as a (tile_n, 1) column; the writeback
    # volume (N*4 bytes) is tiny vs. the logits read (N*C*itemsize), so the
    # lane-sparse store is not on the critical path.
    # TODO(synk): lane-dense (1, tile_n) writeback if C ever becomes < 32.
    per_sample = pl.pallas_call(
        _ce_kernel,
        out_shape=jax.ShapeDtypeStruct((N, 1), jnp.float32),
        grid_spec=pltpu.PrefetchScalarGridSpec(
            num_scalar_prefetch=0,
            grid=grid,
            in_specs=[
                pl.BlockSpec((tile_n, C), lambda i: (i, 0)),
                pl.BlockSpec((tile_n, 1), lambda i: (i, 0)),
                pl.BlockSpec((tile_n, 1), lambda i: (i, 0)),
            ],
            out_specs=pl.BlockSpec((tile_n, 1), lambda i: (i, 0)),
        ),
        compiler_params=pltpu.CompilerParams(
            dimension_semantics=("parallel",),
            vmem_limit_bytes=32 * 1024 * 1024),
    )(cls_score, lab2, w2)
    return per_sample[:, 0]


class CrossEntropyLoss:
    """JAX/Pallas equivalent of mmdet CrossEntropyLoss (softmax path)."""

    def __init__(self, use_sigmoid=False, use_mask=False,
                 reduction='mean', loss_weight=1.0):
        assert use_sigmoid is False or use_mask is False
        # TODO(synk): use_sigmoid (binary_cross_entropy) and use_mask
        # (mask_cross_entropy) variants are not implemented as Pallas kernels.
        assert not use_sigmoid and not use_mask, \
            "only the default softmax cross-entropy path is implemented"
        self.reduction = reduction
        self.loss_weight = loss_weight

    def __call__(self, cls_score, label, weight=None, avg_factor=None,
                 reduction_override=None):
        assert reduction_override in (None, 'none', 'mean', 'sum')
        reduction = reduction_override if reduction_override else self.reduction
        n = cls_score.shape[0]
        if weight is None:
            weight = jnp.ones((n,), jnp.float32)

        per_sample = _pallas_softmax_ce(cls_score, label, weight)

        if avg_factor is None:
            if reduction == 'mean':
                loss = jnp.sum(per_sample) / n
            elif reduction == 'sum':
                loss = jnp.sum(per_sample)
            else:  # 'none'
                loss = per_sample
        else:
            if reduction == 'mean':
                loss = jnp.sum(per_sample) / avg_factor
            elif reduction == 'none':
                loss = per_sample
            else:
                raise ValueError(
                    'avg_factor can not be used with reduction="sum"')
        return self.loss_weight * loss


def _reference(cls_score, label, weight, reduction='mean',
               avg_factor=None, loss_weight=1.0):
    logits = cls_score.astype(jnp.float32)
    n, c = logits.shape
    logp = jax.nn.log_softmax(logits, axis=-1)
    valid = (label >= 0) & (label < c)
    safe_label = jnp.where(valid, label, 0)
    per = -logp[jnp.arange(n), safe_label]
    per = jnp.where(valid, per, 0.0) * weight.astype(jnp.float32)
    if avg_factor is None:
        if reduction == 'mean':
            out = per.mean()
        elif reduction == 'sum':
            out = per.sum()
        else:
            out = per
    else:
        out = per.sum() / avg_factor if reduction == 'mean' else per
    return loss_weight * out


if __name__ == "__main__":
    key = jax.random.PRNGKey(0)
    k1, k2, k3, k4, k5 = jax.random.split(key, 5)

    ok = True

    # --- Case A: N=10, C=32 (single ragged tile) -----------------------------
    N, C = 10, 32
    cls_score = jax.random.normal(k1, (N, C), dtype=jnp.float32)
    label = jax.random.randint(k2, (N,), 0, C, dtype=jnp.int32)
    weight = jax.random.uniform(k3, (N,), dtype=jnp.float32)

    loss_fn = CrossEntropyLoss(reduction='mean', loss_weight=1.0)

    out_mean = loss_fn(cls_score, label, weight=weight)
    jax.block_until_ready(out_mean)
    ok &= bool(jnp.allclose(out_mean,
                            _reference(cls_score, label, weight, 'mean'),
                            rtol=1e-5, atol=1e-5))

    out_sum = loss_fn(cls_score, label, reduction_override='sum')
    jax.block_until_ready(out_sum)
    ok &= bool(jnp.allclose(out_sum,
                            _reference(cls_score, label,
                                       jnp.ones((N,), jnp.float32), 'sum'),
                            rtol=1e-5, atol=1e-5))

    out_none = loss_fn(cls_score, label, weight=weight,
                       reduction_override='none')
    jax.block_until_ready(out_none)
    ok &= bool(jnp.allclose(out_none,
                            _reference(cls_score, label, weight, 'none'),
                            rtol=1e-5, atol=1e-5))

    out_avg = loss_fn(cls_score, label, weight=weight, avg_factor=7.0)
    jax.block_until_ready(out_avg)
    ok &= bool(jnp.allclose(out_avg,
                            _reference(cls_score, label, weight, 'mean',
                                       avg_factor=7.0),
                            rtol=1e-5, atol=1e-5))

    # --- Case B: multi-tile ragged grid (N=20, forced tile_n=8) + ignore ----
    N2, C2 = 20, 32
    cls2 = jax.random.normal(k4, (N2, C2), dtype=jnp.float32)
    lab2 = jax.random.randint(k5, (N2,), 0, C2, dtype=jnp.int32)
    lab2 = lab2.at[3].set(-100)   # torch-style ignored sample -> zero loss
    w2 = jnp.ones((N2,), jnp.float32)
    per_b = _pallas_softmax_ce(cls2, lab2, w2, tile_n=8)
    jax.block_until_ready(per_b)
    ok &= bool(jnp.allclose(per_b,
                            _reference(cls2, lab2, w2, 'none'),
                            rtol=1e-5, atol=1e-5))

    if ok:
        print("KERNEL_OK")
    else:
        print("MISMATCH")
</pallas_src>

<mosaic_0001>
module attributes {stable_mosaic.version = 11 : i64} {
  func.func @_ce_kernel(%arg0: i32, %arg1: memref<16x32xf32, #tpu.memory_space<vmem>>, %arg2: memref<16x1xi32, #tpu.memory_space<vmem>>, %arg3: memref<16x1xf32, #tpu.memory_space<vmem>>, %arg4: memref<16x1xf32, #tpu.memory_space<vmem>>) attributes {dimension_semantics = [#tpu.dimension_semantics<parallel>], iteration_bounds = array<i64: 1>, scalar_prefetch = 0 : i64, scratch_operands = 0 : i64, tpu.core_type = #tpu.core_type<tc>, window_params = [{transform_indices = @transform_0, window_bounds = array<i64: 16, 32>}, {transform_indices = @transform_1, window_bounds = array<i64: 16, 1>}, {transform_indices = @transform_2, window_bounds = array<i64: 16, 1>}, {transform_indices = @transform_3, window_bounds = array<i64: 16, 1>}]} {
    %c0 = arith.constant 0 : index
    %c0_0 = arith.constant 0 : index
    %0 = vector.load %arg1[%c0, %c0_0] : memref<16x32xf32, #tpu.memory_space<vmem>>, vector<16x32xf32>
    %cst = arith.constant dense<0xFF800000> : vector<16xf32>
    %1 = vector.multi_reduction <maximumf>, %0, %cst [1] : vector<16x32xf32> to vector<16xf32>
    %2 = vector.shape_cast %1 : vector<16xf32> to vector<16x1xf32>
    %3 = vector.broadcast %2 : vector<16x1xf32> to vector<16x32xf32>
    %4 = arith.subf %0, %3 : vector<16x32xf32>
    %5 = math.exp %4 : vector<16x32xf32>
    %cst_1 = arith.constant dense<0.000000e+00> : vector<16xf32>
    %6 = vector.multi_reduction <add>, %5, %cst_1 [1] : vector<16x32xf32> to vector<16xf32>
    %7 = vector.shape_cast %6 : vector<16xf32> to vector<16x1xf32>
    %8 = math.log %7 : vector<16x1xf32>
    %9 = arith.addf %2, %8 : vector<16x1xf32>
    %c0_2 = arith.constant 0 : index
    %c0_3 = arith.constant 0 : index
    %10 = vector.load %arg2[%c0_2, %c0_3] : memref<16x1xi32, #tpu.memory_space<vmem>>, vector<16x1xi32>
    %11 = tpu.iota {dimensions = array<i32: 1>} : vector<16x32xi32>
    %12 = vector.broadcast %10 : vector<16x1xi32> to vector<16x32xi32>
    %13 = arith.cmpi eq, %11, %12 : vector<16x32xi32>
    %cst_4 = arith.constant 0.000000e+00 : f32
    %14 = vector.broadcast %cst_4 : f32 to vector<16x32xf32>
    %15 = arith.select %13, %0, %14 : vector<16x32xi1>, vector<16x32xf32>
    %cst_5 = arith.constant dense<0.000000e+00> : vector<16xf32>
    %16 = vector.multi_reduction <add>, %15, %cst_5 [1] : vector<16x32xf32> to vector<16xf32>
    %17 = vector.shape_cast %16 : vector<16xf32> to vector<16x1xf32>
    %c0_i32 = arith.constant 0 : i32
    %18 = vector.broadcast %c0_i32 : i32 to vector<16x1xi32>
    %19 = arith.cmpi sge, %10, %18 : vector<16x1xi32>
    %c32_i32 = arith.constant 32 : i32
    %20 = vector.broadcast %c32_i32 : i32 to vector<16x1xi32>
    %21 = arith.cmpi slt, %10, %20 : vector<16x1xi32>
    %22 = arith.andi %19, %21 : vector<16x1xi1>
    %23 = arith.subf %9, %17 : vector<16x1xf32>
    %cst_6 = arith.constant 0.000000e+00 : f32
    %24 = vector.broadcast %cst_6 : f32 to vector<16x1xf32>
    %25 = arith.select %22, %23, %24 : vector<16x1xi1>, vector<16x1xf32>
    %c0_7 = arith.constant 0 : index
    %c0_8 = arith.constant 0 : index
    %26 = vector.load %arg3[%c0_7, %c0_8] : memref<16x1xf32, #tpu.memory_space<vmem>>, vector<16x1xf32>
    %27 = arith.mulf %25, %26 : vector<16x1xf32>
    %c0_9 = arith.constant 0 : index
    %c0_10 = arith.constant 0 : index
    %28 = vector.load %arg4[%c0_9, %c0_10] : memref<16x1xf32, #tpu.memory_space<vmem>>, vector<16x1xf32>
    tpu.vector_store %arg4[%c0_9, %c0_10], %27 {strides = array<i32>} : memref<16x1xf32, #tpu.memory_space<vmem>>, vector<16x1xf32>,
    return
  }
  func.func @transform_0(%arg0: i32) -> (i32, i32) {
    %c0_i32 = arith.constant 0 : i32
    %c0_i32_0 = arith.constant 0 : i32
    return %arg0, %c0_i32 : i32, i32
  }
  func.func @transform_1(%arg0: i32) -> (i32, i32) {
    %c0_i32 = arith.constant 0 : i32
    %c0_i32_0 = arith.constant 0 : i32
    return %arg0, %c0_i32 : i32, i32
  }
  func.func @transform_2(%arg0: i32) -> (i32, i32) {
    %c0_i32 = arith.constant 0 : i32
    %c0_i32_0 = arith.constant 0 : i32
    return %arg0, %c0_i32 : i32, i32
  }
  func.func @transform_3(%arg0: i32) -> (i32, i32) {
    %c0_i32 = arith.constant 0 : i32
    %c0_i32_0 = arith.constant 0 : i32
    return %arg0, %c0_i32 : i32, i32
  }
}

</mosaic_0001>

<bundles_post_ra>
// kernel: tpu_custom_call.1
= control target key start
LH: loop header
LB: loop body
LE: loop exit
PB: predicated region body
PF: predicated region fallthrough
CT: control target
= control target key end

     0   :  { %vm16_vm0 = vcmask 261120   ;;  %v93_v2 = vmov 0   ;;  %v43_v13 = vlaneseq  ;;  %vm75_vm8 = vcmask 7168   ;;  %s144_s0 = inlined_call_operand.vmem [shape: f32[10,32], index: 0, kind: input, shape index: {}]   ;;  %s145_s1 = inlined_call_operand.vmem [shape: s32[10,1], index: 1, kind: input, shape index: {}]   ;;  %s146_s2 = inlined_call_operand.vmem [shape: f32[10,1], index: 2, kind: input, shape index: {}]   ;;  %s147_s3 = inlined_call_operand.vmem [shape: f32[10,1], index: 3, kind: output, shape index: {}]  }
   0x1   :  { %v14_v0 = vld [vmem:[%s144_s0] sm:$0xff]  ;;  %v15_v1 = vld [vmem:[%s144_s0 + $0x8] sm:$0xff]  ;;  %83 = vset.pattern.permute.xlu1 %v93_v2  ;;  %84 = vset.pattern.permute.xlu0 %v93_v2 }
   0x2   :  { %v41_v3 = vld [vmem:[%s145_s1] sm:$0xff]  ;;  %v17_v4 = vsel %vm16_vm0, %v14_v0, -inf  ;;  %v42_v5 = vld [vmem:[%s145_s1 + $0x8] sm:$0xff]  ;;  %v20_v6 = vsel %vm16_vm0, %v15_v1, -inf  ;;  %v44_v15 = vand.u32 127, %v43_v13 }
   0x3   :  { %46 = vperm.xlu1 %83, %v41_v3   ;;  %18 = vmax.xlane.f32.xlu0 %v17_v4  ;;  %vm61_vm3 = vcmp.ge.s32.totalorder %v41_v3, 0  ;;  %vm63_vm4 = vcmp.lt.s32.totalorder %v41_v3, 32  ;;  %vm62_vm6 = vcmp.ge.s32.totalorder %v42_v5, 0  ;;  %vm64_vm7 = vcmp.lt.s32.totalorder %v42_v5, 32  ;;  %v71_v33 = vld [vmem:[%s146_s2] sm:$0xff]  ;;  %v72_v39 = vld [vmem:[%s146_s2 + $0x8] sm:$0xff] }
   0x4   :  { %vm65_vm5 = vmand %vm61_vm3, %vm63_vm4 }
   0x5   :  { %vm66_vm9 = vmand %vm62_vm6, %vm64_vm7 }
   0x7   :  { %49 = vperm.xlu1 %83, %v42_v5   ;;  %21 = vmax.xlane.f32.xlu0 %v20_v6 }
  0x7e   :  { %v47_v14 = vpop.permute.xlu1 %46 }
  0x7f   :  { %vm51_vm1 = vcmp.eq.s32.totalorder %v44_v15, %v47_v14 }
  0x80   :  { %v53_v18 = vsel %vm51_vm1, %v14_v0, 0.0 }
  0x81   :  { %v55_v20 = vsel %vm16_vm0, %v53_v18, 0.0 }
  0x82   :  { %v50_v16 = vpop.permute.xlu1 %49 }
  0x83   :  { %vm52_vm2 = vcmp.eq.s32.totalorder %v44_v15, %v50_v16 }
  0x84   :  { %v54_v22 = vsel %vm52_vm2, %v15_v1, 0.0 }
  0x85   :  { %v58_v24 = vsel %vm16_vm0, %v54_v22, 0.0 }
  0x8c   :  { %v19_v7 = vpop.xlane.xlu0 %18 }
  0x8d   :  { %v23_v8 = vsub.f32 %v14_v0, %v19_v7 }
  0x8f   :  { %v25_v9 = vmul.f32 1.442695, %v23_v8 }
  0x90   :  { %v22_v10 = vpop.xlane.xlu0 %21 }
  0x91   :  { %85 = vpow2.f32 %v25_v9  ;;  %v24_v11 = vsub.f32 %v15_v1, %v22_v10 }
  0x93   :  { %v27_v12 = vmul.f32 1.442695, %v24_v11 }
  0x95   :  { %87 = vpow2.f32 %v27_v12 }
  0x9e   :  { %v86_v17 = vpop.eup %85 }
  0x9f   :  { %v29_v19 = vsel %vm16_vm0, %v86_v17, 0.0 }
  0xa0   :  { %30 = vadd.xlane.f32.xlu0 %v29_v19 }
  0xa2   :  { %v88_v21 = vpop.eup %87 }
  0xa3   :  { %v32_v23 = vsel %vm16_vm0, %v88_v21, 0.0 }
  0xa4   :  { %33 = vadd.xlane.f32.xlu1 %v32_v23  ;;  %56 = vadd.xlane.f32.xlu0 %v55_v20 }
  0xa8   :  { %59 = vadd.xlane.f32.xlu0 %v58_v24 }
 0x129   :  { %v31_v25 = vpop.xlane.xlu0 %30 }
 0x12a   :  { %89 = vlog2.f32 %v31_v25 }
 0x12d   :  { %v34_v26 = vpop.xlane.xlu1 %33  ;;  %v57_v29 = vpop.xlane.xlu0 %56 }
 0x12e   :  { %91 = vlog2.f32 %v34_v26 }
 0x131   :  { %v60_v38 = vpop.xlane.xlu0 %59 }
 0x137   :  { %v90_v27 = vpop.eup %89 }
 0x138   :  { %v36_v28 = vmul.f32 0.6931472, %v90_v27 }
 0x13a   :  { %v39_v30 = vadd.f32 %v36_v28, %v19_v7 }
 0x13b   :  { %v92_v31 = vpop.eup %91 }
 0x13c   :  { %v38_v32 = vmul.f32 0.6931472, %v92_v31  ;;  %v67_v34 = vsub.f32 %v39_v30, %v57_v29 }
 0x13e   :  { %v69_v35 = vsel %vm65_vm5, %v67_v34, 0.0  ;;  %v40_v36 = vadd.f32 %v38_v32, %v22_v10 }
 0x13f   :  { %v73_v37 = vmul.f32 %v71_v33, %v69_v35 }
 0x140   :  { %v68_v40 = vsub.f32 %v40_v36, %v60_v38 }
 0x141   :  { %76 = vst.msk [vmem:[%s147_s3] sm:$0xff] %vm75_vm8, %v73_v37 }
 0x142   :  { %v70_v41 = vsel %vm66_vm9, %v68_v40, 0.0 }
 0x143   :  { %v74_v42 = vmul.f32 %v72_v39, %v70_v41 }
 0x145   :  { %77 = vst.msk [vmem:[%s147_s3 + $0x8] sm:$0xff] %vm75_vm8, %v74_v42 }

</bundles_post_ra>
